<compile_context>
chip_gen: v6e
topology: v6e:2x2x1
jax: 0.10.0
libtpu: 0.0.40
codegen_flags: <defaults>
</compile_context>

<pallas_src>
import jax
import jax.numpy as jnp
from jax.experimental import pallas as pl
from jax.experimental.pallas import tpu as pltpu

PEPTIDE_SIZE = 33

# Below this many bytes the pallas_call is pure overhead (launch + ~0.35 us
# per grid step dwarf the copy); just do the metadata reshape.
_SMALL_INPUT_BYTES = 1 << 20  # 1 MiB

_LANE = 128


def _copy_kernel(x_ref, o_ref):
    # Lane-dense 2-D copy: full (TB, TF) blocks, no relayout inside the kernel.
    o_ref[...] = x_ref[...]


def _round_up(x, m):
    return ((x + m - 1) // m) * m


def _vmem_capacity_bytes():
    """Physical VMEM per TensorCore (falls back to the smallest modern part)."""
    try:
        cap = getattr(pltpu.get_tpu_info(), "vmem_capacity_bytes", None)
        if cap:
            return int(cap)
    except Exception:
        pass
    return 64 << 20  # v7x physical per-TC; safe lower bound for v5e/v6e too


def _vmem_budget_bytes(cap):
    # Total bytes for the ~4 resident tiles (double-buffered input + output).
    # Never size against 128 MiB: cap at 48 MiB so v7x (64 MiB physical) is
    # safe; floor at 14 MiB so v5e still uses most of its 16 MiB default.
    return max(14 << 20, min(48 << 20, cap // 2))


def _sublane_multiple(itemsize):
    # Sub-32-bit dtypes pack along sublanes: 8 rows (f32), 16 (bf16/f16),
    # 32 (int8/fp8).  Hard legality is "multiple of 8 or full dim"; this keeps
    # partial last blocks relayout-free for packed dtypes.
    return max(8, 32 // max(1, itemsize))


def _pick_tiles(b, f, itemsize, budget):
    """Pick (TB, TF) so ~4 resident tiles stay under `budget`, blocks lane-dense."""
    mult = _sublane_multiple(itemsize)
    row_bytes = f * itemsize
    max_rows = budget // max(1, 4 * row_bytes)

    if max_rows >= mult or max_rows >= b:
        # Full feature axis in one lane-dense block; tile the batch only.
        tf = f
        tb = b if b <= max_rows else max(mult, (max_rows // mult) * mult)
        # Prefer >= ~4 grid steps on big batches: overlaps input DMA of block
        # i+1 with writeback of block i, and lets v7x's 2 TCs split the work.
        if b > 4 * mult:
            tb = min(tb, max(mult, _round_up(pl.cdiv(b, 4), mult)))
        tb = min(tb, b)
        if tb != b and tb % 8 != 0:  # legality: multiple of 8 or full dim
            tb = max(8, (tb // 8) * 8)
        return tb, tf

    # Very wide F: also tile the lane axis so the VMEM budget is never exceeded.
    tb = b if b <= mult else mult
    max_lanes = budget // max(1, 4 * tb * itemsize)
    tf = max(_LANE, (max_lanes // _LANE) * _LANE)
    if tf >= f:
        tf = f
    return tb, tf


def one_hot_reshape(x, peptide_size=PEPTIDE_SIZE, *, use_kernel=None):
    """JAX/Pallas equivalent of oneHot.forward.

    x: (B, F) with F a multiple of `peptide_size`.
    returns: (B, peptide_size, F // peptide_size), same dtype.

    use_kernel: None -> auto (Pallas copy stub only above the 1 MiB threshold),
                True/False -> force / skip the Pallas stub explicitly.
    """
    b, f = x.shape
    assert f % peptide_size == 0, "feature dim must be divisible by peptideSize"
    k = f // peptide_size
    itemsize = jnp.dtype(x.dtype).itemsize
    total_bytes = b * f * itemsize

    if use_kernel is None:
        use_kernel = total_bytes >= _SMALL_INPUT_BYTES
    if not use_kernel:
        # torch.reshape on a contiguous tensor == row-major metadata reshape:
        # free in XLA, no HBM traffic, no kernel launch.
        return jnp.reshape(x, (b, peptide_size, k))

    cap = _vmem_capacity_bytes()
    budget = _vmem_budget_bytes(cap)
    tb, tf = _pick_tiles(b, f, itemsize, budget)
    grid = (pl.cdiv(b, tb), pl.cdiv(f, tf))

    y = pl.pallas_call(
        _copy_kernel,
        out_shape=jax.ShapeDtypeStruct((b, f), x.dtype),
        grid=grid,
        in_specs=[pl.BlockSpec((tb, tf), lambda i, j: (i, j))],
        out_specs=pl.BlockSpec((tb, tf), lambda i, j: (i, j)),
        compiler_params=pltpu.CompilerParams(
            dimension_semantics=("parallel", "parallel"),
            vmem_limit_bytes=min(cap * 3 // 4, 96 << 20),
            allow_input_fusion=[True],
        ),
        cost_estimate=pl.CostEstimate(
            flops=0,
            transcendentals=0,
            bytes_accessed=2 * total_bytes),
    )(x)

    # The actual oneHot semantics: contiguous row-major reshape (metadata-only
    # in XLA, done outside the kernel so the kernel stays lane-dense).
    return jnp.reshape(y, (b, peptide_size, k))


if __name__ == "__main__":
    key = jax.random.PRNGKey(0)
    k_small, k_med = jax.random.split(key)

    # Small shapes consistent with the module: batch=2, 8 peptide positions.
    B, K = 2, 8
    F = PEPTIDE_SIZE * K  # 264
    x_small = jax.random.normal(k_small, (B, F), dtype=jnp.float32)
    ref_small = jnp.reshape(x_small, (B, PEPTIDE_SIZE, K))

    # Auto path: below the 1 MiB threshold -> pure metadata reshape (no kernel).
    out_auto = one_hot_reshape(x_small)
    jax.block_until_ready(out_auto)
    assert out_auto.shape == (B, PEPTIDE_SIZE, K)
    assert out_auto.dtype == x_small.dtype
    assert jnp.array_equal(out_auto, ref_small)

    # Forced Pallas path on the same small input (exercise the kernel itself).
    out_kernel = one_hot_reshape(x_small, use_kernel=True)
    jax.block_until_ready(out_kernel)
    assert jnp.array_equal(out_kernel, ref_small)

    # Medium input that crosses the threshold: multi-step, double-buffered grid.
    B2, K2 = 512, 64
    F2 = PEPTIDE_SIZE * K2  # 2112 -> ~4.1 MiB f32
    x_med = jax.random.normal(k_med, (B2, F2), dtype=jnp.float32)
    out_med = one_hot_reshape(x_med)
    jax.block_until_ready(out_med)
    ref_med = jnp.reshape(x_med, (B2, PEPTIDE_SIZE, K2))
    assert out_med.shape == (B2, PEPTIDE_SIZE, K2)
    assert jnp.array_equal(out_med, ref_med)

    print("KERNEL_OK")
</pallas_src>

<mosaic_0001>
module attributes {stable_mosaic.version = 11 : i64} {
  func.func @_copy_kernel(%arg0: i32, %arg1: i32, %arg2: memref<2x264xf32, #tpu.memory_space<vmem>>, %arg3: memref<2x264xf32, #tpu.memory_space<vmem>>) attributes {dimension_semantics = [#tpu.dimension_semantics<parallel>, #tpu.dimension_semantics<parallel>], iteration_bounds = array<i64: 1, 1>, scalar_prefetch = 0 : i64, scratch_operands = 0 : i64, tpu.core_type = #tpu.core_type<tc>, window_params = [{transform_indices = @transform_0, window_bounds = array<i64: 2, 264>}, {transform_indices = @transform_1, window_bounds = array<i64: 2, 264>}]} {
    %c0 = arith.constant 0 : index
    %c0_0 = arith.constant 0 : index
    %0 = vector.load %arg2[%c0, %c0_0] : memref<2x264xf32, #tpu.memory_space<vmem>>, vector<2x264xf32>
    %c0_1 = arith.constant 0 : index
    %c0_2 = arith.constant 0 : index
    %1 = vector.load %arg3[%c0_1, %c0_2] : memref<2x264xf32, #tpu.memory_space<vmem>>, vector<2x264xf32>
    tpu.vector_store %arg3[%c0_1, %c0_2], %0 {strides = array<i32>} : memref<2x264xf32, #tpu.memory_space<vmem>>, vector<2x264xf32>,
    return
  }
  func.func @transform_0(%arg0: i32, %arg1: i32) -> (i32, i32) {
    %c0_i32 = arith.constant 0 : i32
    return %arg0, %arg1 : i32, i32
  }
  func.func @transform_1(%arg0: i32, %arg1: i32) -> (i32, i32) {
    %c0_i32 = arith.constant 0 : i32
    return %arg0, %arg1 : i32, i32
  }
}

</mosaic_0001>

<bundles_post_ra>
// kernel: tpu_custom_call.1
= control target key start
LH: loop header
LB: loop body
LE: loop exit
PB: predicated region body
PF: predicated region fallthrough
CT: control target
= control target key end

     0   :  { %6 = vsyncpa [#allocation3], 0  ;;  %s107_s0 = inlined_call_operand.hbm [shape: f32[2,264], index: 0, kind: input, shape index: {}]   ;;  %s108_s1 = inlined_call_operand.hbm [shape: f32[2,264], index: 1, kind: output, shape index: {}]  }
   0x1   :  { %7 = vsyncpa [#allocation4], 0  ;;  %s89_s6 = smov [#allocation2]  }
   0x2   :  { %s14_s7 = sshll.u32 %s89_s6, 4  ;;  %s15_s7 = int_to_ptr.vmem [resolvable:$true] %s14_s7 }
   0x3   :  { %s53_s8 = scalar_lea.vmem %s15_s7, 96  ;;  %p58_p1 = scmp.lt.s32.totalorder %s15_s7, %s15_s7 }
   0x4   :  { %p54_p0 = scmp.ne.s32.totalorder %s15_s7, %s53_s8  ;;  %p59_p2 = scmp.lt.s32.totalorder %s53_s8, %s53_s8 }
   0x6   :  { %p60_p3 = por %p59_p2, %p58_p1 }
   0x8   :  { %p61_p4 = pnand %p60_p3, %p54_p0 }
   0xa   :  { %64 = shalt.err (!%p61_p4)
}
   0xb   :  { %17 = dma.hbm_to_vmem [thread:$0]  %s107_s0, 96, %s15_s7, [#allocation3]  }
   0xc   :  { %85 = dma.done.wait [#allocation3], 96  }
   0xd   :  { %86 = vsyncadd [#allocation3], 4294967200  ;;  %vm22_vm0 = vcmask 1041408   ;;  %vm23_vm1 = vcmask 1043458   ;;  %vm25_vm3 = vcmask 62468   ;;  %s90_s11 = smov [#allocation5]  }
   0xe   :  { %vm24_vm2 = vmor %vm23_vm1, %vm22_vm0  ;;  %s34_s12 = sshll.u32 %s90_s11, 4  ;;  %v21_v0 = vld [vmem:[#allocation2] sm:$0x3f]  ;;  %s35_s12 = int_to_ptr.vmem [resolvable:$true] %s34_s12 }
   0xf   :  { %vm26_vm4 = vmor %vm25_vm3, %vm24_vm2  ;;  %s65_s13 = scalar_lea.vmem %s35_s12, 96  ;;  %p70_p6 = scmp.lt.s32.totalorder %s35_s12, %s35_s12 }
  0x10   :  { %27 = vst.msk [vmem:[#allocation5] sm:$0x3f] %vm26_vm4, %v21_v0  ;;  %p66_p5 = scmp.ne.s32.totalorder %s35_s12, %s65_s13  ;;  %p71_p7 = scmp.lt.s32.totalorder %s65_s13, %s65_s13 }
  0x12   :  { %p72_p8 = por %p71_p7, %p70_p6 }
  0x14   :  { %p73_p9 = pnand %p72_p8, %p66_p5 }
  0x16   :  { %76 = shalt.err (!%p73_p9)
}
  0x17   :  { %37 = dma.vmem_to_hbm [thread:$0]  %s35_s12, 96, %s108_s1, [#allocation4]  }
  0x18   :  { %87 = dma.done.wait [#allocation4], 96  }
  0x19   :  { %88 = vsyncadd [#allocation4], 4294967200 }
  0x1a   :  { %41 = vsyncpa [#allocation3], 1 }
  0x1b   :  { %42 = vsyncpa [#allocation4], 1 }

</bundles_post_ra>
